<compile_context>
chip_gen: v7x
topology: tpu7x:2x2x1
jax: 0.10.0
libtpu: 0.0.40
codegen_flags: <defaults>
</compile_context>

<pallas_src>
import functools
import math

import jax
import jax.numpy as jnp
from jax.experimental import pallas as pl
from jax.experimental.pallas import tpu as pltpu


def _round_up(v, m):
    return ((v + m - 1) // m) * m


def _dice_sums_kernel(x_ref, gt_ref, tp_ref, sq_ref, cnt_ref, *,
                      kt, ts, s_total, apply_softmax, needs_mask):
    p = pl.program_id(0)        # parallel split of the spatial axis (megacore)
    k = pl.program_id(1)        # reduction steps within the split

    @pl.when(k == 0)
    def _init():
        tp_ref[...] = jnp.zeros_like(tp_ref)
        sq_ref[...] = jnp.zeros_like(sq_ref)
        cnt_ref[...] = jnp.zeros_like(cnt_ref)

    x = x_ref[...].astype(jnp.float32)          # (B, C, TS)
    gt = gt_ref[...]                            # (B, TS) int32

    if apply_softmax:
        # channel axis is unblocked, so the softmax reduce is fully in-block
        m = jnp.max(x, axis=1, keepdims=True)
        e = jnp.exp(x - m)
        x = e * pl.reciprocal(jnp.sum(e, axis=1, keepdims=True), approx=True)

    c_iota = jax.lax.broadcasted_iota(jnp.int32, x.shape, 1)     # (B, C, TS)
    is_c = gt[:, None, :] == c_iota                              # one-hot mask

    if needs_mask:
        # mask spatial padding (only emitted when S % (nsplit*kt*ts) != 0)
        base = (p * kt + k) * ts
        lane = jax.lax.broadcasted_iota(jnp.int32, gt.shape, 1)  # (B, TS)
        valid = (base + lane) < s_total
        is_c = is_c & valid[:, None, :]
        x = x * valid[:, None, :].astype(x.dtype)

    tp_ref[...] += jnp.sum(jnp.where(is_c, x, 0.0), axis=-1)[None]      # sum x*y
    sq_ref[...] += jnp.sum(x * x, axis=-1)[None]                         # sum x^2
    cnt_ref[...] += jnp.sum(is_c.astype(jnp.float32), axis=-1)[None]     # sum y^2 (=sum y)


def _dice_sums(x_bcs, gt_bs, *, ts, apply_softmax):
    B, C, S = x_bcs.shape

    ts = max(128, (int(ts) // 128) * 128)
    ts = min(ts, _round_up(S, 128))
    total_tiles = -(-S // ts)
    nsplit = 2 if total_tiles >= 2 else 1      # use both TensorCores on v7x
    kt = -(-total_tiles // nsplit)
    s_pad = nsplit * kt * ts

    if s_pad != S:
        x_bcs = jnp.pad(x_bcs, ((0, 0), (0, 0), (0, s_pad - S)))
        gt_bs = jnp.pad(gt_bs, ((0, 0), (0, s_pad - S)))

    kernel = functools.partial(
        _dice_sums_kernel, kt=kt, ts=ts, s_total=S,
        apply_softmax=apply_softmax, needs_mask=(s_pad != S))

    x_tile_bytes = B * C * ts * x_bcs.dtype.itemsize
    gt_tile_bytes = B * ts * 4
    vmem_limit = int(min(100 << 20,
                         max(4 << 20, 4 * (x_tile_bytes + gt_tile_bytes) + (2 << 20))))

    out_sds = jax.ShapeDtypeStruct((nsplit, B, C), jnp.float32)
    out_map = lambda p, k: (p, 0, 0)

    tp, sq, cnt = pl.pallas_call(
        kernel,
        out_shape=(out_sds, out_sds, out_sds),
        grid_spec=pltpu.PrefetchScalarGridSpec(
            num_scalar_prefetch=0,
            grid=(nsplit, kt),
            in_specs=[
                pl.BlockSpec((B, C, ts), lambda p, k: (0, 0, p * kt + k)),
                pl.BlockSpec((B, ts), lambda p, k: (0, p * kt + k)),
            ],
            out_specs=(
                pl.BlockSpec((1, B, C), out_map),
                pl.BlockSpec((1, B, C), out_map),
                pl.BlockSpec((1, B, C), out_map),
            ),
        ),
        compiler_params=pltpu.CompilerParams(
            dimension_semantics=("parallel", "arbitrary"),
            vmem_limit_bytes=vmem_limit,
        ),
    )(x_bcs, gt_bs)

    # add the partial sums of the parallel splits
    return tp.sum(axis=0), sq.sum(axis=0), cnt.sum(axis=0)


def soft_dice_loss_squared(x, y, *, batch_dice=False, do_bg=True, smooth=1.0,
                           apply_softmax=False, ts=2048):
    """SoftDiceLossSquared forward.

    x: (B, C, *spatial) probabilities, or raw logits with apply_softmax=True
       (equivalent to apply_nonlin=softmax).
    y: (B, 1, *spatial) or (B, *spatial) integer label map.
    """
    # TODO(synk): loss_mask and the y.shape == x.shape (soft / pre-one-hot
    # label) paths of the torch module are not implemented (label-map y only).
    shp = x.shape
    B, C = int(shp[0]), int(shp[1])
    S = int(math.prod(shp[2:]))
    x_bcs = x.reshape(B, C, S)                        # keep input dtype (bf16 OK)
    gt_bs = jnp.reshape(y, (B, -1)).astype(jnp.int32)

    tp, sq, cnt = _dice_sums(x_bcs, gt_bs, ts=ts, apply_softmax=apply_softmax)

    if batch_dice:
        intersect = jnp.sum(tp, axis=0)               # (C,)
        denominator = jnp.sum(sq + cnt, axis=0)       # (C,)
    else:
        intersect = tp                                # (B, C)
        denominator = sq + cnt

    intersect = intersect + smooth
    denominator = denominator + smooth
    dc = 2.0 * intersect / denominator

    if not do_bg:
        dc = dc[1:] if batch_dice else dc[:, 1:]
    return -jnp.mean(dc)


def _reference(x, y, *, batch_dice, do_bg, smooth, apply_softmax):
    x = x.astype(jnp.float32)
    if apply_softmax:
        x = jax.nn.softmax(x, axis=1)
    B, C = x.shape[0], x.shape[1]
    yl = jnp.reshape(y, (B, 1) + x.shape[2:]).astype(jnp.int32)
    classes = jnp.arange(C, dtype=jnp.int32).reshape((1, C) + (1,) * (x.ndim - 2))
    y_onehot = (yl == classes).astype(jnp.float32)
    axes = tuple(([0] if batch_dice else []) + list(range(2, x.ndim)))
    intersect = jnp.sum(x * y_onehot, axis=axes) + smooth
    denominator = jnp.sum(x * x + y_onehot * y_onehot, axis=axes) + smooth
    dc = 2.0 * intersect / denominator
    if not do_bg:
        dc = dc[1:] if batch_dice else dc[:, 1:]
    return -jnp.mean(dc)


if __name__ == "__main__":
    key = jax.random.PRNGKey(0)
    k1, k2, k3, k4 = jax.random.split(key, 4)

    # 2D case: raw logits, softmax fused inside the kernel (apply_nonlin=softmax)
    B, C, H, W = 2, 4, 16, 16
    logits = jax.random.normal(k1, (B, C, H, W), dtype=jnp.float32)
    labels = jax.random.randint(k2, (B, 1, H, W), 0, C, dtype=jnp.int32)

    loss = soft_dice_loss_squared(logits, labels, batch_dice=False, do_bg=True,
                                  smooth=1.0, apply_softmax=True, ts=128)
    loss = jax.block_until_ready(loss)
    ref = _reference(logits, labels, batch_dice=False, do_bg=True, smooth=1.0,
                     apply_softmax=True)
    assert jnp.isfinite(loss), "loss is not finite"
    assert jnp.allclose(loss, ref, rtol=2e-2, atol=2e-3), (loss, ref)

    # batch_dice / no-background variant on the same data
    loss_bd = soft_dice_loss_squared(logits, labels, batch_dice=True, do_bg=False,
                                     smooth=1.0, apply_softmax=True, ts=128)
    loss_bd = jax.block_until_ready(loss_bd)
    ref_bd = _reference(logits, labels, batch_dice=True, do_bg=False, smooth=1.0,
                        apply_softmax=True)
    assert jnp.isfinite(loss_bd), "batch_dice loss is not finite"
    assert jnp.allclose(loss_bd, ref_bd, rtol=2e-2, atol=2e-3), (loss_bd, ref_bd)

    # 3D case with ragged spatial size (exercises padding mask + parallel split)
    B3, C3, D3, H3, W3 = 1, 3, 5, 7, 9
    probs3 = jax.nn.softmax(
        jax.random.normal(k3, (B3, C3, D3, H3, W3), dtype=jnp.float32), axis=1)
    labels3 = jax.random.randint(k4, (B3, 1, D3, H3, W3), 0, C3, dtype=jnp.int32)
    loss3 = soft_dice_loss_squared(probs3, labels3, batch_dice=False, do_bg=False,
                                   smooth=1.0, apply_softmax=False, ts=128)
    loss3 = jax.block_until_ready(loss3)
    ref3 = _reference(probs3, labels3, batch_dice=False, do_bg=False, smooth=1.0,
                      apply_softmax=False)
    assert jnp.isfinite(loss3), "3D loss is not finite"
    assert jnp.allclose(loss3, ref3, rtol=2e-2, atol=2e-3), (loss3, ref3)

    print("KERNEL_OK")
</pallas_src>

<mosaic_0001>
module attributes {stable_mosaic.version = 11 : i64} {
  func.func @_dice_sums_kernel(%arg0: i32, %arg1: i32, %arg2: memref<2x4x128xf32, #tpu.memory_space<vmem>>, %arg3: memref<2x128xi32, #tpu.memory_space<vmem>>, %arg4: memref<1x2x4xf32, #tpu.memory_space<vmem>>, %arg5: memref<1x2x4xf32, #tpu.memory_space<vmem>>, %arg6: memref<1x2x4xf32, #tpu.memory_space<vmem>>) attributes {dimension_semantics = [#tpu.dimension_semantics<parallel>, #tpu.dimension_semantics<arbitrary>], iteration_bounds = array<i64: 2, 1>, scalar_prefetch = 0 : i64, scratch_operands = 0 : i64, tpu.core_type = #tpu.core_type<tc>, window_params = [{transform_indices = @transform_0, window_bounds = array<i64: 2, 4, 128>}, {transform_indices = @transform_1, window_bounds = array<i64: 2, 128>}, {transform_indices = @transform_2, window_bounds = array<i64: 1, 2, 4>}, {transform_indices = @transform_3, window_bounds = array<i64: 1, 2, 4>}, {transform_indices = @transform_4, window_bounds = array<i64: 1, 2, 4>}]} {
    %c0_i32 = arith.constant 0 : i32
    %0 = arith.cmpi eq, %arg1, %c0_i32 : i32
    %1 = arith.extui %0 : i1 to i32
    %c0_i32_0 = arith.constant 0 : i32
    %2 = arith.cmpi ne, %1, %c0_i32_0 : i32
    scf.if %2 {
      %cst_28 = arith.constant 0.000000e+00 : f32
      %39 = vector.broadcast %cst_28 : f32 to vector<1x2x4xf32>
      %c0_29 = arith.constant 0 : index
      %c0_30 = arith.constant 0 : index
      %c0_31 = arith.constant 0 : index
      %40 = vector.load %arg4[%c0_29, %c0_30, %c0_31] : memref<1x2x4xf32, #tpu.memory_space<vmem>>, vector<1x2x4xf32>
      tpu.vector_store %arg4[%c0_29, %c0_30, %c0_31], %39 {strides = array<i32>} : memref<1x2x4xf32, #tpu.memory_space<vmem>>, vector<1x2x4xf32>,
      %cst_32 = arith.constant 0.000000e+00 : f32
      %41 = vector.broadcast %cst_32 : f32 to vector<1x2x4xf32>
      %c0_33 = arith.constant 0 : index
      %c0_34 = arith.constant 0 : index
      %c0_35 = arith.constant 0 : index
      %42 = vector.load %arg5[%c0_33, %c0_34, %c0_35] : memref<1x2x4xf32, #tpu.memory_space<vmem>>, vector<1x2x4xf32>
      tpu.vector_store %arg5[%c0_33, %c0_34, %c0_35], %41 {strides = array<i32>} : memref<1x2x4xf32, #tpu.memory_space<vmem>>, vector<1x2x4xf32>,
      %cst_36 = arith.constant 0.000000e+00 : f32
      %43 = vector.broadcast %cst_36 : f32 to vector<1x2x4xf32>
      %c0_37 = arith.constant 0 : index
      %c0_38 = arith.constant 0 : index
      %c0_39 = arith.constant 0 : index
      %44 = vector.load %arg6[%c0_37, %c0_38, %c0_39] : memref<1x2x4xf32, #tpu.memory_space<vmem>>, vector<1x2x4xf32>
      tpu.vector_store %arg6[%c0_37, %c0_38, %c0_39], %43 {strides = array<i32>} : memref<1x2x4xf32, #tpu.memory_space<vmem>>, vector<1x2x4xf32>,
    } else {
    }
    %c0 = arith.constant 0 : index
    %c0_1 = arith.constant 0 : index
    %c0_2 = arith.constant 0 : index
    %3 = vector.load %arg2[%c0, %c0_1, %c0_2] : memref<2x4x128xf32, #tpu.memory_space<vmem>>, vector<2x4x128xf32>
    %c0_3 = arith.constant 0 : index
    %c0_4 = arith.constant 0 : index
    %4 = vector.load %arg3[%c0_3, %c0_4] : memref<2x128xi32, #tpu.memory_space<vmem>>, vector<2x128xi32>
    %cst = arith.constant dense<0xFF800000> : vector<2x128xf32>
    %5 = vector.multi_reduction <maximumf>, %3, %cst [1] : vector<2x4x128xf32> to vector<2x128xf32>
    %6 = vector.shape_cast %5 : vector<2x128xf32> to vector<2x1x128xf32>
    %7 = vector.broadcast %6 : vector<2x1x128xf32> to vector<2x4x128xf32>
    %8 = arith.subf %3, %7 : vector<2x4x128xf32>
    %9 = math.exp %8 : vector<2x4x128xf32>
    %cst_5 = arith.constant dense<0.000000e+00> : vector<2x128xf32>
    %10 = vector.multi_reduction <add>, %9, %cst_5 [1] : vector<2x4x128xf32> to vector<2x128xf32>
    %11 = vector.shape_cast %10 : vector<2x128xf32> to vector<2x1x128xf32>
    %12 = tpu.reciprocal %11 {approx = true} : vector<2x1x128xf32> -> vector<2x1x128xf32>
    %13 = vector.broadcast %12 : vector<2x1x128xf32> to vector<2x4x128xf32>
    %14 = arith.mulf %9, %13 : vector<2x4x128xf32>
    %15 = tpu.iota {dimensions = array<i32: 1>} : vector<2x4x128xi32>
    %16 = vector.shape_cast %4 : vector<2x128xi32> to vector<2x1x128xi32>
    %17 = vector.broadcast %16 : vector<2x1x128xi32> to vector<2x4x128xi32>
    %18 = arith.cmpi eq, %17, %15 : vector<2x4x128xi32>
    %c0_6 = arith.constant 0 : index
    %c0_7 = arith.constant 0 : index
    %c0_8 = arith.constant 0 : index
    %19 = vector.load %arg4[%c0_6, %c0_7, %c0_8] : memref<1x2x4xf32, #tpu.memory_space<vmem>>, vector<1x2x4xf32>
    %cst_9 = arith.constant 0.000000e+00 : f32
    %20 = vector.broadcast %cst_9 : f32 to vector<2x4x128xf32>
    %21 = arith.select %18, %14, %20 : vector<2x4x128xi1>, vector<2x4x128xf32>
    %cst_10 = arith.constant dense<0.000000e+00> : vector<2x4xf32>
    %22 = vector.multi_reduction <add>, %21, %cst_10 [2] : vector<2x4x128xf32> to vector<2x4xf32>
    %23 = vector.shape_cast %22 : vector<2x4xf32> to vector<1x2x4xf32>
    %24 = arith.addf %19, %23 : vector<1x2x4xf32>
    %c0_11 = arith.constant 0 : index
    %c0_12 = arith.constant 0 : index
    %c0_13 = arith.constant 0 : index
    %25 = vector.load %arg4[%c0_11, %c0_12, %c0_13] : memref<1x2x4xf32, #tpu.memory_space<vmem>>, vector<1x2x4xf32>
    tpu.vector_store %arg4[%c0_11, %c0_12, %c0_13], %24 {strides = array<i32>} : memref<1x2x4xf32, #tpu.memory_space<vmem>>, vector<1x2x4xf32>,
    %c0_14 = arith.constant 0 : index
    %c0_15 = arith.constant 0 : index
    %c0_16 = arith.constant 0 : index
    %26 = vector.load %arg5[%c0_14, %c0_15, %c0_16] : memref<1x2x4xf32, #tpu.memory_space<vmem>>, vector<1x2x4xf32>
    %27 = arith.mulf %14, %14 : vector<2x4x128xf32>
    %cst_17 = arith.constant dense<0.000000e+00> : vector<2x4xf32>
    %28 = vector.multi_reduction <add>, %27, %cst_17 [2] : vector<2x4x128xf32> to vector<2x4xf32>
    %29 = vector.shape_cast %28 : vector<2x4xf32> to vector<1x2x4xf32>
    %30 = arith.addf %26, %29 : vector<1x2x4xf32>
    %c0_18 = arith.constant 0 : index
    %c0_19 = arith.constant 0 : index
    %c0_20 = arith.constant 0 : index
    %31 = vector.load %arg5[%c0_18, %c0_19, %c0_20] : memref<1x2x4xf32, #tpu.memory_space<vmem>>, vector<1x2x4xf32>
    tpu.vector_store %arg5[%c0_18, %c0_19, %c0_20], %30 {strides = array<i32>} : memref<1x2x4xf32, #tpu.memory_space<vmem>>, vector<1x2x4xf32>,
    %c0_21 = arith.constant 0 : index
    %c0_22 = arith.constant 0 : index
    %c0_23 = arith.constant 0 : index
    %32 = vector.load %arg6[%c0_21, %c0_22, %c0_23] : memref<1x2x4xf32, #tpu.memory_space<vmem>>, vector<1x2x4xf32>
    %33 = arith.extui %18 : vector<2x4x128xi1> to vector<2x4x128xi32>
    %34 = arith.sitofp %33 : vector<2x4x128xi32> to vector<2x4x128xf32>
    %cst_24 = arith.constant dense<0.000000e+00> : vector<2x4xf32>
    %35 = vector.multi_reduction <add>, %34, %cst_24 [2] : vector<2x4x128xf32> to vector<2x4xf32>
    %36 = vector.shape_cast %35 : vector<2x4xf32> to vector<1x2x4xf32>
    %37 = arith.addf %32, %36 : vector<1x2x4xf32>
    %c0_25 = arith.constant 0 : index
    %c0_26 = arith.constant 0 : index
    %c0_27 = arith.constant 0 : index
    %38 = vector.load %arg6[%c0_25, %c0_26, %c0_27] : memref<1x2x4xf32, #tpu.memory_space<vmem>>, vector<1x2x4xf32>
    tpu.vector_store %arg6[%c0_25, %c0_26, %c0_27], %37 {strides = array<i32>} : memref<1x2x4xf32, #tpu.memory_space<vmem>>, vector<1x2x4xf32>,
    return
  }
  func.func @transform_0(%arg0: i32, %arg1: i32) -> (i32, i32, i32) {
    %c1_i32 = arith.constant 1 : i32
    %0 = arith.muli %arg0, %c1_i32 : i32
    %1 = arith.addi %0, %arg1 : i32
    %c0_i32 = arith.constant 0 : i32
    %c0_i32_0 = arith.constant 0 : i32
    %c0_i32_1 = arith.constant 0 : i32
    return %c0_i32, %c0_i32_0, %1 : i32, i32, i32
  }
  func.func @transform_1(%arg0: i32, %arg1: i32) -> (i32, i32) {
    %c1_i32 = arith.constant 1 : i32
    %0 = arith.muli %arg0, %c1_i32 : i32
    %1 = arith.addi %0, %arg1 : i32
    %c0_i32 = arith.constant 0 : i32
    %c0_i32_0 = arith.constant 0 : i32
    return %c0_i32, %1 : i32, i32
  }
  func.func @transform_2(%arg0: i32, %arg1: i32) -> (i32, i32, i32) {
    %c0_i32 = arith.constant 0 : i32
    %c0_i32_0 = arith.constant 0 : i32
    %c0_i32_1 = arith.constant 0 : i32
    return %arg0, %c0_i32, %c0_i32_0 : i32, i32, i32
  }
  func.func @transform_3(%arg0: i32, %arg1: i32) -> (i32, i32, i32) {
    %c0_i32 = arith.constant 0 : i32
    %c0_i32_0 = arith.constant 0 : i32
    %c0_i32_1 = arith.constant 0 : i32
    return %arg0, %c0_i32, %c0_i32_0 : i32, i32, i32
  }
  func.func @transform_4(%arg0: i32, %arg1: i32) -> (i32, i32, i32) {
    %c0_i32 = arith.constant 0 : i32
    %c0_i32_0 = arith.constant 0 : i32
    %c0_i32_1 = arith.constant 0 : i32
    return %arg0, %c0_i32, %c0_i32_0 : i32, i32, i32
  }
}

</mosaic_0001>

<bundles_post_ra>
// kernel: tpu_custom_call.1
= control target key start
LH: loop header
LB: loop body
LE: loop exit
PB: predicated region body
PF: predicated region fallthrough
CT: control target
= control target key end

     0   :  { %s1370_s0 = inlined_call_operand.hbm [shape: f32[2,4,256], index: 0, kind: input, shape index: {}]   ;;  %s1371_s1 = inlined_call_operand.hbm [shape: s32[2,256], index: 1, kind: input, shape index: {}]   ;;  %s1372_s2 = inlined_call_operand.hbm [shape: f32[2,2,4], index: 2, kind: output, shape index: {0}]   ;;  %s1373_s3 = inlined_call_operand.hbm [shape: f32[2,2,4], index: 3, kind: output, shape index: {1}]   ;;  %s1374_s4 = inlined_call_operand.hbm [shape: f32[2,2,4], index: 4, kind: output, shape index: {2}]  }
   0x1   :  { %1379 = sst [smem:[#allocation16_spill]] %s1370_s0 }
   0x2   :  { %10 = vsyncpa [#allocation3], 0 }
   0x3   :  { %12 = vsyncpa [#allocation3 + $0x1], 0 }
   0x4   :  { %13 = vsyncpa [#allocation6], 0 }
   0x5   :  { %15 = vsyncpa [#allocation6 + $0x1], 0 }
   0x6   :  { %16 = vsyncpa [#allocation4], 0 }
   0x7   :  { %18 = vsyncpa [#allocation4 + $0x1], 0 }
   0x8   :  { %19 = vsyncpa [#allocation9], 0 }
   0x9   :  { %21 = vsyncpa [#allocation9 + $0x1], 0  ;;  %s1021_s15 = smov 0   ;;  %s1023_s16 = smov 0  }
   0xa   :  { %s1025_s17 = smov 0   ;;  %s1027_s18 = smov 0  }
   0xb   :  { %s1029_s19 = smov 0   ;;  %s1031_s20 = smov 0  }
   0xc LB: > { %s1052_s21 = sadd.s32 4294967295, %s984_s20   ;;  %s1376_s22 = sadd.s32 4294967294, %s984_s20   ;;  %s984_s20 = sphi %s1031_s20, %s27_s20   ;;  %s980_s19 = sphi %s1029_s19, %s1399_s19   ;;  %s976_s18 = sphi %s1027_s18, %s1398_s18   ;;  %s972_s17 = sphi %s1025_s17, %s1397_s17   ;;  %s968_s16 = sphi %s1023_s16, %s1396_s16   ;;  %s964_s15 = sphi %s1021_s15, %s1395_s15  }
   0xd   : > { %s39_s23 = sadd.s32 1, %s980_s19  ;;  %s48_s24 = sadd.s32 1, %s972_s17 }
   0xe   : > { %p41_p0 = scmp.ge.s32.totalorder %s39_s23, 2  ;;  %p55_p1 = scmp.ne.s32.totalorder %s972_s17, %s968_s16 }
   0xf   : > { %p56_p2 = scmp.eq.s32.totalorder %s984_s20, 0  ;;  %p61_p3 = scmp.ne.s32.totalorder %s968_s16, %s964_s15 }
  0x10   : > { %s1401_s23 = smov (%p41_p0, %s39_s23), 0  ;;  %p62_p5 = scmp.eq.s32.totalorder %s1052_s21, 0 }
  0x11   : > { %1380 = sst [smem:[#allocation15_spill]] %s1401_s23  ;;  %p1064_p4 = por %p56_p2, %p55_p1 }
  0x12   : > { %s45_s26 = ssub.s32 %s980_s19, %s1401_s23  ;;  %p113_p6 = scmp.eq.s32.totalorder %s1052_s21, 1 }
  0x13   : > { %p46_p7 = scmp.eq.s32.totalorder %s45_s26, 0  ;;  %p1072_p8 = por %p62_p5, %p61_p3 }
  0x14   : > { %p1076_p9 = por %p113_p6, %p55_p1  ;;  %p119_p10 = scmp.eq.s32.totalorder %s1376_s22, 1 }
  0x15   : > { %s1382_s27 = scalar_select %p1072_p8, 1, 0 }
  0x16   : > { %s1383_s28 = scalar_select %p1076_p9, 1, 0 }
  0x17   : > { %s1083_s29 = scalar_select %p46_p7, %s972_s17, %s48_s24  }
  0x18   : > { %p1085_p11 = por %p119_p10, %p61_p3  ;;  %p715_p13 = scmp.lt.s32.totalorder %s984_s20, 2 }
  0x19   : > { %s1092_s5 = sand.u32 1, %s972_s17   ;;  %s668_s7 = sshll.u32 %s980_s19, 6 }
  0x1a   : > { %s1384_s30 = scalar_select %p1085_p11, 1, 0 }
  0x1b   : > { %s667_s6 = sshll.u32 %s1092_s5, 3  ;;  %s1385_s0 = sld [smem:[#allocation16_spill]] }
  0x1c   : > { %s195_s11 = scalar_lea.vmem [#allocation2], %s667_s6  ;;  %p1105_p0 = pnand %p715_p13, %p1064_p4 }
  0x1d   : > { %s202_s12 = sshll.u32 %s195_s11, 4  ;;  %s192_s14 = scalar_lea.sflag [#allocation3], %s1092_s5  ;;  %s1101_s12 = int_to_ptr.vmem [resolvable:$true] %s202_s12 }
  0x1e   : > { %p780_p2 = pneg %p1105_p0 }
  0x21   : > { %s1099_s10 = scalar_lea.hbm %s1385_s0, %s668_s7  ;;  %s783_s7 = scalar_lea.hbm %s1385_s0, 256 }
  0x22   : > { %s778_s24 = scalar_lea.hbm %s1099_s10, 128  ;;  %p784_p4 = scmp.lt.u32.totalorder %s1099_s10, %s1385_s0 }
  0x23   : > { %p779_p1 = scmp.ne.s32.totalorder %s1099_s10, %s778_s24  ;;  %p785_p6 = scmp.lt.u32.totalorder %s783_s7, %s778_s24 }
  0x24   : > { %p787_p10 = scmp.lt.u32.totalorder %s778_s24, %s1099_s10 }
  0x25   : > { %p781_p3 = pnand %p780_p2, %p779_p1  ;;  %p786_p7 = por %p785_p6, %p784_p4 }
  0x27   : > { %p782_p5 = pneg %p781_p3  ;;  %p788_p13 = por %p787_p10, %p786_p7 }
  0x29   : > { %p789_p12 = pnand %p788_p13, %p782_p5 }
  0x2b   : > { %792 = shalt.err (!%p789_p12)
}
  0x2c   : > { %s793_s9 = scalar_lea.vmem %s1101_s12, 128  ;;  %s986_s11 = smov [#allocation2]  }
  0x2d   : > { %p794_p1 = scmp.ne.s32.totalorder %s1101_s12, %s793_s9  ;;  %s798_s26 = sshll.u32 %s986_s11, 4  ;;  %s799_s26 = int_to_ptr.vmem [resolvable:$false] %s798_s26 }
  0x2e   : > { %s800_s6 = scalar_lea.vmem %s799_s26, 256  ;;  %p801_p9 = scmp.lt.s32.totalorder %s1101_s12, %s799_s26 }
  0x2f   : > { %p796_p3 = pnand %p794_p1, %p780_p2  ;;  %p802_p4 = scmp.lt.s32.totalorder %s800_s6, %s793_s9 }
  0x31   : > { %p797_p11 = pneg %p796_p3  ;;  %p803_p6 = por %p802_p4, %p801_p9 }
  0x33   : > { %p804_p7 = pnand %p803_p6, %p797_p11 }
  0x35   : > { %807 = shalt.err (!%p804_p7)
}
  0x36   : > { %s987_s24 = smov 128   ;;  %s988_s7 = smov 64  }
  0x37   : > { %s989_s25 = smov 4   ;;  %p671_p12 = scmp.ge.s32.totalorder %s984_s20, 1 }
  0x38   : > { %701 = dma.hbm_to_vmem [thread:$0]  (!%p1105_p0), %s1099_s10, 128, %s1101_s12, %s192_s14, %s987_s24, %s988_s7, %s989_s25  }
  0x39   : > { %p229_p9 = scmp.lt.s32.totalorder %s984_s20, 3  ;;  %s669_s8 = sshll.u32 %s1092_s5, 1 }
  0x3a   : > { %s670_s11 = sshll.u32 %s980_s19, 5  ;;  %s216_s26 = scalar_lea.vmem [#allocation5], %s669_s8 }
  0x3b   : > { %p1140_p11 = pnand %p671_p12, %p229_p9  ;;  %s224_s6 = sshll.u32 %s216_s26, 4  ;;  %s225_s6 = int_to_ptr.vmem [resolvable:$true] %s224_s6 }
  0x3c   : > { %s1148_s23 = scalar_lea.hbm %s1371_s1, %s670_s11  ;;  %s213_s10 = scalar_lea.sflag [#allocation6], %s1092_s5 }
  0x3d   : > { %s1387_s9 = scalar_select %p1140_p11, 1, 0 }
  0x3e   : > { %s808_s12 = scalar_lea.hbm %s1148_s23, 32  ;;  %s813_s7 = scalar_lea.hbm %s1371_s1, 64 }
  0x3f   : > { %p809_p5 = scmp.ne.s32.totalorder %s1148_s23, %s808_s12  ;;  %p814_p1 = scmp.lt.u32.totalorder %s1148_s23, %s1371_s1 }
  0x40   : > { %p815_p3 = scmp.lt.u32.totalorder %s813_s7, %s808_s12  ;;  %p817_p6 = scmp.lt.u32.totalorder %s808_s12, %s1148_s23 }
  0x41   : > { %p811_p10 = pnand %p809_p5, %p780_p2 }
  0x42   : > { %p816_p4 = por %p815_p3, %p814_p1 }
  0x43   : > { %p812_p13 = pneg %p811_p10 }
  0x44   : > { %p818_p7 = por %p817_p6, %p816_p4 }
  0x46   : > { %p819_p12 = pnand %p818_p7, %p812_p13 }
  0x48   : > { %822 = shalt.err (!%p819_p12)
}
  0x49   : > { %s823_s22 = scalar_lea.vmem %s225_s6, 32  ;;  %s990_s5 = smov [#allocation5]  }
  0x4a   : > { %p824_p9 = scmp.ne.s32.totalorder %s225_s6, %s823_s22  ;;  %s828_s8 = sshll.u32 %s990_s5, 4  ;;  %s829_s8 = int_to_ptr.vmem [resolvable:$false] %s828_s8 }
  0x4b   : > { %s830_s11 = scalar_lea.vmem %s829_s8, 64  ;;  %p831_p8 = scmp.lt.s32.totalorder %s225_s6, %s829_s8 }
  0x4c   : > { %p826_p5 = pnand %p824_p9, %p780_p2  ;;  %p832_p11 = scmp.lt.s32.totalorder %s830_s11, %s823_s22 }
  0x4e   : > { %p827_p10 = pneg %p826_p5  ;;  %p833_p1 = por %p832_p11, %p831_p8 }
  0x50   : > { %p834_p3 = pnand %p833_p1, %p827_p10 }
  0x52   : > { %837 = shalt.err (!%p834_p3)
}
  0x53   : > { %704 = dma.hbm_to_vmem [thread:$0]  (!%p1105_p0), %s1148_s23, 32, %s225_s6, %s213_s10  }
  0x54   : > { %p1388_p13 = scmp.ne.s32.totalorder %s1387_s9, 0 }
  0x55   : > { %s1173_s26 = sand.u32 (!%p1388_p13), 1, %s968_s16   ;;  %p1389_p2 = scmp.ne.s32.totalorder (!%p1388_p13), %s1382_s27, 0 }
  0x56   : > { %233 = sbr.rel (%p1388_p13) target bundleno = 366 (0x16e), region = 28  ;;  %s672_s12 = sshll.u32 (!%p1388_p13), %s1173_s26, 3 }
  0x57   : > { %s236_s14 = scalar_lea.sflag (!%p1388_p13), [#allocation3], %s1173_s26  ;;  %s239_s24 = scalar_lea.vmem (!%p1388_p13), [#allocation2], %s672_s12 }
  0x5d   : > { %947 = dma.done.wait (%p1389_p2), %s236_s14, 128  }
  0x5e   : > { %949 = vsyncadd (%p1389_p2), %s236_s14, 4294967168  ;;  %s1182_s23 = sshll.u32 %s1173_s26, 1  ;;  %s245_s13 = scalar_lea.sflag [#allocation6], %s1173_s26 }
  0x5f   : > { %s248_s9 = scalar_lea.vmem [#allocation5], %s1182_s23 }
  0x60   : > { %951 = dma.done.wait (%p1389_p2), %s245_s13, 32  }
  0x61   : > { %953 = vsyncadd (%p1389_p2), %s245_s13, 4294967264  ;;  %v340_v0 = vlaneseq  ;;  %vm301_vm0 = vcmask 1043456   ;;  %v298_v4 = vld [vmem:[%s239_s24] sm:$0xf]  ;;  %v299_v6 = vld [vmem:[%s239_s24 + $0x4] sm:$0xf] }
  0x62   : > { %v302_v5 = vsel %vm301_vm0, %v298_v4, -inf  ;;  %v309_v8 = vsel %vm301_vm0, %v299_v6, -inf  ;;  %v991_v31 = vmov 1966171168   ;;  %v992_v63 = vmov 0.0   ;;  %s1216_s27 = scalar_lea.vmem [#allocation7], %s1182_s23 }
  0x63   : > { %v1190_v1 = vshrl.u32 %v340_v0, 7  ;;  %v386_v2 = vand.u32 127, %v340_v0  ;;  %v303_v7 = vrot.slane %v302_v5, 4  ;;  %v310_v9 = vrot.slane %v309_v8, 4  ;;  %s1221_s6 = scalar_lea.vmem [#allocation8], %s1182_s23  ;;  %s1226_s10 = scalar_lea.vmem [#allocation10], %s1182_s23 }
  0x64   : > { %v351_v32 = vunpack.c.l.s4 %v991_v31  ;;  %v677_v41 = vld.sshfl [vmem:[%s248_s9] sm:$0x11 pattern:$0x75316420]  ;;  %vm294_vm3 = vcmask 25600   ;;  %vm395_vm4 = vcmask 1041409  }
  0x65   : > { %v1193_v3 = vsub.s32 %v386_v2, %v1190_v1  ;;  %v304_v10 = vmax.f32 %v302_v5, %v303_v7  ;;  %v311_v11 = vmax.f32 %v309_v8, %v310_v9  ;;  %v349_v44 = vcombine.high %v677_v41, %v677_v41  ;;  %295 = vst.msk [vmem:[%s1216_s27] sm:$0x3] %vm294_vm3, %v992_v63  ;;  %s454_s7 = sand.u32 1, %s1052_s21   ;;  %s1235_s25 = sshll.u32 %s976_s18, 5 }
  0x66   : > { %v352_v37 = vunpack.c.0.s8 %v351_v32  ;;  %v366_v47 = vsub.s32 0, %v1190_v1  ;;  %296 = vst.msk [vmem:[%s1221_s6] sm:$0x3] %vm294_vm3, %v992_v63  ;;  %297 = vst.msk [vmem:[%s1226_s10] sm:$0x3] %vm294_vm3, %v992_v63  ;;  %s473_s0 = sshll.u32 %s1216_s27, 4  ;;  %s1248_s8 = scalar_lea.hbm %s1372_s2, %s1235_s25  ;;  %s1250_s0 = int_to_ptr.vmem [resolvable:$true] %s473_s0 }
  0x67   : > { %v305_v12 = vrot.slane %v304_v10, 2  ;;  %v312_v13 = vrot.slane %v311_v11, 2  ;;  %s486_s22 = sshll.u32 %s1221_s6, 4  ;;  %s1257_s14 = scalar_lea.hbm %s1373_s3, %s1235_s25  ;;  %s1259_s22 = int_to_ptr.vmem [resolvable:$true] %s486_s22 }
  0x68   : > { %v355_v43 = vsub.s32 %v352_v37, %v1190_v1  ;;  %s499_s24 = sshll.u32 %s1226_s10, 4  ;;  %s450_s23 = scalar_lea.sflag [#allocation4], %s1173_s26  ;;  %s500_s24 = int_to_ptr.vmem [resolvable:$true] %s499_s24 }
  0x69   : > { %v306_v14 = vmax.f32 %v304_v10, %v305_v12  ;;  %v313_v15 = vmax.f32 %v311_v11, %v312_v13  ;;  %s838_s13 = scalar_lea.vmem %s1250_s0, 32  ;;  %p1390_p0 = scmp.ne.s32.totalorder %s1383_s28, 0 }
  0x6a   : > { %v356_v46 = vrot.slane %v677_v41, %v355_v43  ;;  %v363_v48 = vrot.slane %v349_v44, %v355_v43  ;;  %p839_p8 = scmp.ne.s32.totalorder %s1250_s0, %s838_s13  ;;  %s993_s9 = smov [#allocation7]  }
  0x6b   : > { %v307_v16 = vrot.slane %v306_v14, 1  ;;  %v314_v17 = vrot.slane %v313_v15, 1  ;;  %s842_s18 = sshll.u32 %s993_s9, 4  ;;  %s843_s18 = int_to_ptr.vmem [resolvable:$false] %s842_s18 }
  0x6c   : > { %v367_v49 = vrot.slane %v356_v46, %v366_v47  ;;  %v371_v50 = vrot.slane %v363_v48, %v366_v47  ;;  %v374_v9 = vld [vmem:[%s1216_s27] sm:$0x3]  ;;  %p840_p11 = pnand %p839_p8, %p1390_p0  ;;  %s844_s5 = scalar_lea.vmem %s843_s18, 64 }
  0x6d   : > { %v308_v18 = vmax.f32 %v306_v14, %v307_v16  ;;  %v315_v19 = vmax.f32 %v313_v15, %v314_v17  ;;  %v401_v13 = vld [vmem:[%s1221_s6] sm:$0x3]  ;;  %p845_p6 = scmp.lt.s32.totalorder %s1250_s0, %s843_s18  ;;  %p846_p7 = scmp.lt.s32.totalorder %s844_s5, %s838_s13 }
  0x6e   : > { %vm372_vm1 = vcmp.eq.s32.totalorder %v367_v49, %v1190_v1  ;;  %vm373_vm2 = vcmp.eq.s32.totalorder %v371_v50, %v1190_v1  ;;  %p841_p4 = pneg %p840_p11 }
  0x6f   : > { %v316_v20 = vsub.f32 %v298_v4, %v308_v18  ;;  %v317_v21 = vsub.f32 %v299_v6, %v315_v19  ;;  %v679_v0 = vsel %vm373_vm2, 1.0, %v992_v63  ;;  %v678_v2 = vsel %vm372_vm1, 1.0, %v992_v63  ;;  %p847_p12 = por %p846_p7, %p845_p6 }
  0x70   : > { %v432_v4 = vsel %vm301_vm0, %v679_v0, 0.0  ;;  %v429_v5 = vsel %vm301_vm0, %v678_v2, 0.0 }
  0x71   : > { %v318_v22 = vmul.f32 1.442695, %v316_v20  ;;  %v320_v23 = vmul.f32 1.442695, %v317_v21  ;;  %p848_p9 = pnand %p847_p12, %p841_p4 }
  0x73   : > { %770 = vpow2.f32 %v318_v22 }
  0x74   : > { %772 = vpow2.f32 %v320_v23  ;;  %v424_v23 = vld [vmem:[%s1226_s10] sm:$0x3] }
  0x7d   : > { %v771_v24 = vpop.eup %770 }
  0x7e   : > { %v773_v25 = vpop.eup %772  ;;  %v322_v26 = vsel %vm301_vm0, %v771_v24, 0.0 }
  0x7f   : > { %v323_v27 = vrot.slane %v322_v26, 4  ;;  %v329_v28 = vsel %vm301_vm0, %v773_v25, 0.0 }
  0x80   : > { %v330_v29 = vrot.slane %v329_v28, 4 }
  0x81   : > { %v324_v30 = vadd.f32 %v323_v27, %v322_v26 }
  0x82   : > { %v331_v33 = vadd.f32 %v330_v29, %v329_v28 }
  0x83   : > { %v325_v34 = vrot.slane %v324_v30, 2 }
  0x84   : > { %v332_v35 = vrot.slane %v331_v33, 2 }
  0x85   : > { %v326_v36 = vadd.f32 %v325_v34, %v324_v30 }
  0x86   : > { %v333_v38 = vadd.f32 %v332_v35, %v331_v33 }
  0x87   : > { %v327_v39 = vrot.slane %v326_v36, 1 }
  0x88   : > { %v334_v40 = vrot.slane %v333_v38, 1 }
  0x89   : > { %v328_v42 = vadd.f32 %v327_v39, %v326_v36 }
  0x8a   : > { %v335_v45 = vadd.f32 %v334_v40, %v333_v38 }
  0x8b   : > { %774 = vrcp.f32 %v328_v42 }
  0x8c   : > { %776 = vrcp.f32 %v335_v45 }
  0x95   : > { %v775_v51 = vpop.eup %774 }
  0x96   : > { %v777_v52 = vpop.eup %776  ;;  %v338_v53 = vmul.f32 %v775_v51, %v771_v24 }
  0x97   : > { %v339_v54 = vmul.f32 %v777_v52, %v773_v25 }
  0x98   : > { %v375_v55 = vsel %vm372_vm1, %v338_v53, 0.0  ;;  %v402_v56 = vmul.f32 %v338_v53, %v338_v53 }
  0x99   : > { %v377_v57 = vsel %vm301_vm0, %v375_v55, 0.0  ;;  %v376_v58 = vsel %vm373_vm2, %v339_v54, 0.0  ;;  %v403_v59 = vmul.f32 %v339_v54, %v339_v54 }
  0x9a   : > { %378 = vadd.xlane.f32.xlu1 %v377_v57  ;;  %v404_v60 = vsel %vm301_vm0, %v402_v56, 0.0  ;;  %v380_v61 = vsel %vm301_vm0, %v376_v58, 0.0 }
  0x9b   : > { %405 = vadd.xlane.f32.xlu0 %v404_v60  ;;  %v407_v62 = vsel %vm301_vm0, %v403_v59, 0.0 }
  0x9e   : > { %381 = vadd.xlane.f32.xlu1 %v380_v61 }
  0x9f   : > { %408 = vadd.xlane.f32.xlu0 %v407_v62 }
  0xa2   : > { %433 = vadd.xlane.f32.xlu1 %v432_v4 }
  0xa3   : > { %430 = vadd.xlane.f32.xlu0 %v429_v5 }
 0x127   : > { %v379_v1 = vpop.xlane.xlu1 %378 }
 0x128   : > { %v406_v6 = vpop.xlane.xlu0 %405  ;;  %v390_v8 = vrot.slane %v379_v1, %v1193_v3 }
 0x129   : > { %v415_v12 = vrot.slane %v406_v6, %v1193_v3 }
 0x12b   : > { %v382_v7 = vpop.xlane.xlu1 %381 }
 0x12c   : > { %v394_v10 = vrot.slane %v382_v7, %v1193_v3  ;;  %v409_v11 = vpop.xlane.xlu0 %408 }
 0x12d   : > { %v419_v14 = vrot.slane %v409_v11, %v1193_v3 }
 0x12e   : > { %v396_v15 = vsel %vm395_vm4, %v394_v10, %v390_v8 }
 0x12f   : > { %v398_v16 = vadd.f32 %v396_v15, %v374_v9  ;;  %v420_v17 = vsel %vm395_vm4, %v419_v14, %v415_v12  ;;  %v434_v18 = vpop.xlane.xlu1 %433 }
 0x130   : > { %v422_v19 = vadd.f32 %v420_v17, %v401_v13  ;;  %v431_v20 = vpop.xlane.xlu0 %430  ;;  %v444_v21 = vrot.slane %v434_v18, %v1193_v3 }
 0x131   : > { %400 = vst.msk [vmem:[%s1216_s27] sm:$0x3] %vm294_vm3, %v398_v16  ;;  %v440_v22 = vrot.slane %v431_v20, %v1193_v3 }
 0x132   : > { %423 = vst.msk [vmem:[%s1221_s6] sm:$0x3] %vm294_vm3, %v422_v19 }
 0x133   : > { %851 = shalt.err (!%p848_p9)
}
 0x134   : > { %s852_s26 = scalar_lea.hbm %s1248_s8, 32  ;;  %s856_s11 = scalar_lea.hbm %s1372_s2, 64 }
 0x135   : > { %p853_p5 = scmp.ne.s32.totalorder %s1248_s8, %s852_s26  ;;  %p857_p3 = scmp.lt.u32.totalorder %s1248_s8, %s1372_s2 }
 0x136   : > { %p858_p13 = scmp.lt.u32.totalorder %s856_s11, %s852_s26  ;;  %p860_p8 = scmp.lt.u32.totalorder %s852_s26, %s1248_s8 }
 0x137   : > { %p854_p10 = pnand %p853_p5, %p1390_p0 }
 0x138   : > { %p859_p2 = por %p858_p13, %p857_p3 }
 0x139   : > { %p855_p1 = pneg %p854_p10 }
 0x13a   : > { %p861_p11 = por %p860_p8, %p859_p2 }
 0x13c   : > { %p862_p4 = pnand %p861_p11, %p855_p1 }
 0x13e   : > { %865 = shalt.err (!%p862_p4)
}
 0x13f   : > { %692 = dma.vmem_to_hbm [thread:$0]  (%p1390_p0), %s1250_s0, 32, %s1248_s8, %s450_s23   ;;  %v445_v3 = vsel %vm395_vm4, %v444_v21, %v440_v22 }
 0x140   : > { %s1293_s13 = scalar_lea.sflag [#allocation9], %s454_s7  ;;  %s866_s18 = scalar_lea.vmem %s1259_s22, 32 }
 0x141   : > { %p867_p6 = scmp.ne.s32.totalorder %s1259_s22, %s866_s18  ;;  %s994_s5 = smov [#allocation8]  }
 0x142   : > { %s870_s26 = sshll.u32 %s994_s5, 4  ;;  %s871_s26 = int_to_ptr.vmem [resolvable:$false] %s870_s26 }
 0x143   : > { %p868_p7 = pnand %p867_p6, %p1390_p0  ;;  %s872_s27 = scalar_lea.vmem %s871_s26, 64 }
 0x144   : > { %p873_p9 = scmp.lt.s32.totalorder %s1259_s22, %s871_s26  ;;  %p874_p5 = scmp.lt.s32.totalorder %s872_s27, %s866_s18 }
 0x145   : > { %p869_p12 = pneg %p868_p7 }
 0x146   : > { %p875_p10 = por %p874_p5, %p873_p9 }
 0x148   : > { %p876_p1 = pnand %p875_p10, %p869_p12 }
 0x14a   : > { %879 = shalt.err (!%p876_p1)
}
 0x14b   : > { %s880_s21 = scalar_lea.hbm %s1257_s14, 32  ;;  %s884_s8 = scalar_lea.hbm %s1373_s3, 64 }
 0x14c   : > { %p881_p3 = scmp.ne.s32.totalorder %s1257_s14, %s880_s21  ;;  %p885_p8 = scmp.lt.u32.totalorder %s1257_s14, %s1373_s3 }
 0x14d   : > { %p886_p11 = scmp.lt.u32.totalorder %s884_s8, %s880_s21  ;;  %p888_p6 = scmp.lt.u32.totalorder %s880_s21, %s1257_s14 }
 0x14e   : > { %p882_p13 = pnand %p881_p3, %p1390_p0 }
 0x14f   : > { %p887_p4 = por %p886_p11, %p885_p8 }
 0x150   : > { %p883_p2 = pneg %p882_p13 }
 0x151   : > { %p889_p7 = por %p888_p6, %p887_p4 }
 0x153   : > { %p890_p12 = pnand %p889_p7, %p883_p2 }
 0x155   : > { %893 = shalt.err (!%p890_p12)
}
 0x156   : > { %693 = dma.vmem_to_hbm [thread:$0]  (%p1390_p0), %s1259_s22, 32, %s1257_s14, %s1293_s13   ;;  %v447_v24 = vadd.f32 %v445_v3, %v424_v23 }
 0x157   : > { %s1321_s9 = scalar_lea.hbm %s1374_s4, %s1235_s25  ;;  %s894_s18 = scalar_lea.vmem %s500_s24, 32 }
 0x158   : > { %448 = vst.msk [vmem:[%s1226_s10] sm:$0x3] %vm294_vm3, %v447_v24  ;;  %p895_p9 = scmp.ne.s32.totalorder %s500_s24, %s894_s18  ;;  %s995_s5 = smov [#allocation10]  }
 0x159   : > { %s898_s26 = sshll.u32 %s995_s5, 4  ;;  %s899_s26 = int_to_ptr.vmem [resolvable:$false] %s898_s26 }
 0x15a   : > { %p896_p5 = pnand %p895_p9, %p1390_p0  ;;  %s900_s27 = scalar_lea.vmem %s899_s26, 64 }
 0x15b   : > { %p901_p1 = scmp.lt.s32.totalorder %s500_s24, %s899_s26  ;;  %p902_p3 = scmp.lt.s32.totalorder %s900_s27, %s894_s18 }
 0x15c   : > { %p897_p10 = pneg %p896_p5 }
 0x15d   : > { %p903_p13 = por %p902_p3, %p901_p1 }
 0x15f   : > { %p904_p2 = pnand %p903_p13, %p897_p10 }
 0x161   : > { %907 = shalt.err (!%p904_p2)
}
 0x162   : > { %s908_s10 = scalar_lea.hbm %s1321_s9, 32  ;;  %s912_s14 = scalar_lea.hbm %s1374_s4, 64 }
 0x163   : > { %p909_p8 = scmp.ne.s32.totalorder %s1321_s9, %s908_s10  ;;  %p913_p6 = scmp.lt.u32.totalorder %s1321_s9, %s1374_s4 }
 0x164   : > { %p914_p7 = scmp.lt.u32.totalorder %s912_s14, %s908_s10  ;;  %p916_p9 = scmp.lt.u32.totalorder %s908_s10, %s1321_s9 }
 0x165   : > { %p910_p11 = pnand %p909_p8, %p1390_p0 }
 0x166   : > { %p915_p12 = por %p914_p7, %p913_p6 }
 0x167   : > { %p911_p4 = pneg %p910_p11 }
 0x168   : > { %p917_p5 = por %p916_p9, %p915_p12 }
 0x16a   : > { %p918_p10 = pnand %p917_p5, %p911_p4 }
 0x16c   : > { %921 = shalt.err (!%p918_p10)
}
 0x16d   : > { %694 = dma.vmem_to_hbm [thread:$0]  (%p1390_p0), %s500_s24, 32, %s1321_s9, %s1293_s13  }
 0x16e PF: > { %s511_s0 = sand.u32 1, %s964_s15   ;;  %p1391_p1 = scmp.ne.s32.totalorder %s1384_s30, 0 }
 0x16f   : > { %p1392_p3 = scmp.ge.s32.totalorder %s984_s20, 2  ;;  %s512_s8 = scalar_lea.sflag [#allocation4], %s511_s0 }
 0x171   : > { %p706_p13 = pnand %p1392_p3, %p1391_p1 }
 0x173   : > { %955 = dma.done.wait (!%p706_p13), %s512_s8, 32  }
 0x174   : > { %957 = vsyncadd (!%p706_p13), %s512_s8, 4294967264  ;;  %s1393_s23 = sadd.s32 4294967294, %s984_s20  }
 0x175   : > { %s520_s6 = sand.u32 1, %s1393_s23  }
 0x176   : > { %s521_s11 = scalar_lea.sflag [#allocation9], %s520_s6 }
 0x177   : > { %959 = dma.done.wait (!%p706_p13), %s521_s11, 64  }
 0x178   : > { %961 = vsyncadd (!%p706_p13), %s521_s11, 4294967232  ;;  %s27_s20 = sadd.s32 1, %s984_s20   ;;  %s1394_s28 = sld [smem:[#allocation15_spill]] }
 0x179   : > { %p24_p0 = scmp.ge.s32.totalorder %s27_s20, 4   ;;  %s1395_s15 = smov %s968_s16 }
 0x17a   : > { %s1396_s16 = smov %s972_s17  ;;  %s1397_s17 = smov %s1083_s29 }
 0x17b   : > { %s1398_s18 = smov %s980_s19  ;;  %26 = sbr.rel (!%p24_p0) target bundleno = 12 (0xc), region = 122 }
 0x17e   : > { %s1399_s19 = smov %s1394_s28 }
 0x182   :  { %535 = vsyncpa [#allocation3], 1 }
 0x183   :  { %537 = vsyncpa [#allocation3 + $0x1], 1 }
 0x184   :  { %538 = vsyncpa [#allocation6], 1 }
 0x185   :  { %540 = vsyncpa [#allocation6 + $0x1], 1 }
 0x186   :  { %541 = vsyncpa [#allocation4], 1 }
 0x187   :  { %543 = vsyncpa [#allocation4 + $0x1], 1 }
 0x188   :  { %544 = vsyncpa [#allocation9], 1 }
 0x189   :  { %546 = vsyncpa [#allocation9 + $0x1], 1 }

</bundles_post_ra>
